<compile_context>
chip_gen: v7x
topology: tpu7x:2x2x1
jax: 0.10.0
libtpu: 0.0.40
codegen_flags: <defaults>
</compile_context>

<pallas_src>
import numpy as np
import jax
import jax.numpy as jnp
from jax.experimental import pallas as pl
from jax.experimental.pallas import tpu as pltpu

LEAKY_SLOPE = 0.01   # nn.LeakyReLU default used by ME.MinkowskiLeakyReLU
BN_EPS = 1e-5


def _round_up(x, m):
    return ((x + m - 1) // m) * m


def _vmem_limit(streaming_bytes, resident_bytes):
    # 2x double-buffer on streaming operands + resident weights, 2x margin,
    # floored at 32 MiB (<= every gen's physical VMEM) and capped at 128 MiB.
    need = 2 * (2 * streaming_bytes + resident_bytes) + (4 << 20)
    return int(min(max(need, 32 << 20), 128 << 20))


# ----------------------------------------------------------------------------
# Pallas kernel 1: sparse conv (K folded into contraction, channels-major)
#   W[Cout, K*Cin] (bf16, BN-scale folded) @ gathered[K*Cin, tile_m] (bf16)
#   -> f32 acc -> +shift -> LeakyReLU -> [Cout, tile_m] (lane-dense store)
# ----------------------------------------------------------------------------
def _conv_bn_lrelu_kernel(g_ref, w_ref, shift_ref, o_ref):
    acc = jnp.dot(w_ref[...], g_ref[...], preferred_element_type=jnp.float32)
    y = acc + shift_ref[...]
    o_ref[...] = jnp.where(y > 0, y, LEAKY_SLOPE * y).astype(o_ref.dtype)


def sparse_conv_bn_lrelu(gathered_cm, w_cm, shift_col, *, tm=512,
                         out_dtype=jnp.bfloat16):
    # gathered_cm: [K*Cin, M] bf16  w_cm: [Cout, K*Cin] bf16  shift_col: [Cout, 1] f32
    KCin, M = gathered_cm.shape
    Cout = w_cm.shape[0]

    tm_eff = tm if M >= tm else M          # block never exceeds the array dim
    grid_m = pl.cdiv(M, tm_eff)            # ragged last tile; OOB writes dropped

    streaming = tm_eff * KCin * gathered_cm.dtype.itemsize \
        + tm_eff * Cout * jnp.dtype(out_dtype).itemsize
    resident = KCin * Cout * w_cm.dtype.itemsize + Cout * 4

    flops = 2 * M * KCin * Cout
    bytes_accessed = (M * KCin * gathered_cm.dtype.itemsize
                      + KCin * Cout * w_cm.dtype.itemsize
                      + M * Cout * jnp.dtype(out_dtype).itemsize)

    return pl.pallas_call(
        _conv_bn_lrelu_kernel,
        out_shape=jax.ShapeDtypeStruct((Cout, M), out_dtype),
        grid=(grid_m,),
        in_specs=[
            pl.BlockSpec((KCin, tm_eff), lambda i: (0, i)),
            pl.BlockSpec((Cout, KCin), lambda i: (0, 0)),
            pl.BlockSpec((Cout, 1), lambda i: (0, 0)),
        ],
        out_specs=pl.BlockSpec((Cout, tm_eff), lambda i: (0, i)),
        compiler_params=pltpu.CompilerParams(
            dimension_semantics=("parallel",),
            vmem_limit_bytes=_vmem_limit(streaming, resident)),
        cost_estimate=pl.CostEstimate(flops=flops, transcendentals=0,
                                      bytes_accessed=bytes_accessed),
    )(gathered_cm, w_cm, shift_col)


# ----------------------------------------------------------------------------
# Pallas kernel 2: fused conv3 + global avg pool + MLP head, tiled over M
#   per-tile: conv3(+shift,LReLU) -> masked one-hot segment-sum into VMEM scratch
#   last tile: pooled mean -> Linear+BN+LReLU -> [Dropout=identity] ->
#              Linear+BN+LReLU -> Linear+bias   (all channels-major, VMEM only)
# ----------------------------------------------------------------------------
def conv3_pool_head(g3, bid_row, inv_counts, p, Bp, *, tm=512):
    KC3, M3 = g3.shape
    C3 = p["conv3_w"].shape[0]
    C2x = p["head_w1"].shape[0]
    C = p["head_w3"].shape[0]

    tm_eff = tm if M3 >= tm else M3
    grid_m = pl.cdiv(M3, tm_eff)

    def kernel(bid_ref, g_ref, w3_ref, sh3_ref, invcnt_ref,
               w1_ref, b1_ref, w2_ref, b2_ref, wf_ref, bf_ref,
               o_ref, psum_ref):
        i = pl.program_id(0)

        @pl.when(i == 0)
        def _():
            psum_ref[...] = jnp.zeros_like(psum_ref)

        f3 = jnp.dot(w3_ref[...], g_ref[...], preferred_element_type=jnp.float32)
        f3 = f3 + sh3_ref[...]
        f3 = jnp.where(f3 > 0, f3, LEAKY_SLOPE * f3)

        # Zero columns past M3 (ragged last tile) so garbage can't pollute the pool.
        col = i * tm_eff + jax.lax.broadcasted_iota(jnp.int32, (1, tm_eff), 1)
        f3 = jnp.where(col < M3, f3, 0.0)

        # MinkowskiGlobalAvgPooling via per-batch segment sum: onehot[b, m] = (bid[m] == b)
        biota = jax.lax.broadcasted_iota(jnp.int32, (Bp, tm_eff), 0)
        onehot = (biota == bid_ref[...]).astype(jnp.float32)
        psum_ref[...] += jax.lax.dot_general(
            f3, onehot, dimension_numbers=(((1,), (1,)), ((), ())),
            preferred_element_type=jnp.float32)                      # [C3, Bp]

        @pl.when(i == pl.num_programs(0) - 1)
        def _():
            pooled = psum_ref[...] * invcnt_ref[...]                 # mean per batch
            h = jnp.dot(w1_ref[...], pooled,
                        preferred_element_type=jnp.float32) + b1_ref[...]
            h = jnp.where(h > 0, h, LEAKY_SLOPE * h)
            # TODO(synk): MinkowskiDropout is identity in eval mode; no stochastic drop.
            h = jnp.dot(w2_ref[...], h,
                        preferred_element_type=jnp.float32) + b2_ref[...]
            h = jnp.where(h > 0, h, LEAKY_SLOPE * h)
            o_ref[...] = (jnp.dot(wf_ref[...], h,
                                  preferred_element_type=jnp.float32)
                          + bf_ref[...]).astype(o_ref.dtype)

    def const(shape):
        return pl.BlockSpec(shape, lambda i: (0,) * len(shape))

    streaming = tm_eff * KC3 * g3.dtype.itemsize + tm_eff * 4
    resident = (KC3 * C3 * 2 + C3 * 4 + Bp * 4
                + (C2x * C3 + C2x + C * C2x + C + C * C + C) * 4
                + C3 * Bp * 4 + C * Bp * 4)

    flops = 2 * M3 * KC3 * C3 + 2 * M3 * C3 * Bp
    bytes_accessed = M3 * KC3 * g3.dtype.itemsize + M3 * 4 + resident

    return pl.pallas_call(
        kernel,
        out_shape=jax.ShapeDtypeStruct((C, Bp), jnp.float32),
        grid=(grid_m,),
        in_specs=[
            pl.BlockSpec((1, tm_eff), lambda i: (0, i)),       # batch id per site
            pl.BlockSpec((KC3, tm_eff), lambda i: (0, i)),     # gathered conv3 input
            const((C3, KC3)), const((C3, 1)), const((1, Bp)),
            const((C2x, C3)), const((C2x, 1)),
            const((C, C2x)), const((C, 1)),
            const((C, C)), const((C, 1)),
        ],
        out_specs=pl.BlockSpec((C, Bp), lambda i: (0, 0)),
        scratch_shapes=[pltpu.VMEM((C3, Bp), jnp.float32)],
        compiler_params=pltpu.CompilerParams(
            dimension_semantics=("arbitrary",),
            vmem_limit_bytes=_vmem_limit(streaming, resident)),
        cost_estimate=pl.CostEstimate(flops=flops, transcendentals=0,
                                      bytes_accessed=int(bytes_accessed)),
    )(bid_row, g3, p["conv3_w"], p["conv3_shift"], inv_counts,
      p["head_w1"], p["head_b1"], p["head_w2"], p["head_b2"],
      p["head_w3"], p["head_bias3"])


# ----------------------------------------------------------------------------
# Minkowski coordinate bookkeeping (glue, numpy)
# ----------------------------------------------------------------------------
def build_offsets():
    r = (-1, 0, 1)
    return np.array([(i, j, k) for i in r for j in r for k in r], dtype=np.int64)  # [27,3]


def downsample_coords(coords, new_ts):
    out = coords.copy()
    out[:, 1:] = (out[:, 1:] // new_ts) * new_ts
    return np.unique(out, axis=0)


def build_kernel_map(in_coords, out_coords, offsets, ts_in):
    # Returns nmap [M, K]; missing neighbors map to index N (appended zero column).
    N = in_coords.shape[0]
    M = out_coords.shape[0]
    K = offsets.shape[0]
    lut = {tuple(c): i for i, c in enumerate(in_coords.tolist())}
    nmap = np.full((M, K), N, dtype=np.int32)
    for k in range(K):
        tgt = out_coords.copy()
        tgt[:, 1:] = tgt[:, 1:] + offsets[k] * ts_in
        for m, c in enumerate(tgt.tolist()):
            nmap[m, k] = lut.get(tuple(c), N)
    return nmap


def gather_neighbors_cm(coords, feats_cm, stride, ts_in, offsets):
    """Gather neighbor features (channels-major) into the K-folded layout [K*Cin, M]."""
    Cin = feats_cm.shape[0]
    if stride == 1:
        out_coords, ts_out = coords, ts_in
    else:
        ts_out = ts_in * stride
        out_coords = downsample_coords(coords, ts_out)
    nmap = build_kernel_map(coords, out_coords, offsets, ts_in)          # [M, K]
    M, K = nmap.shape
    feats_pad = jnp.concatenate(
        [feats_cm, jnp.zeros((Cin, 1), feats_cm.dtype)], axis=1)         # zero col sentinel
    g = feats_pad[:, jnp.asarray(nmap)]                                  # [Cin, M, K]
    # TODO(synk): this 27x duplication is XLA-side; an in-kernel row-gather would avoid it.
    g = jnp.transpose(g, (2, 0, 1)).reshape(K * Cin, M)                  # [K*Cin, M]
    return out_coords, g, ts_out


# ----------------------------------------------------------------------------
# Deterministic parameter construction (BN folded in eval mode; scale folded into weights)
# ----------------------------------------------------------------------------
def init_all_params(key, channels):
    p = {}
    keys = iter(jax.random.split(key, 32))
    Koff = 27

    def nrm(shape, s):
        return s * jax.random.normal(next(keys), shape, dtype=jnp.float32)

    def bn_params(cout):
        gamma = 1.0 + 0.1 * nrm((cout,), 1.0)
        beta = 0.1 * nrm((cout,), 1.0)
        rmean = 0.05 * nrm((cout,), 1.0)
        rvar = 1.0 + 0.1 * jnp.abs(nrm((cout,), 1.0))
        scale = gamma / jnp.sqrt(rvar + BN_EPS)
        shift = beta - rmean * scale
        return scale, shift

    # ME conv weight [kernel_volume, Cin, Cout] (bias=False). Fold BN scale in f32,
    # then store channels-major [Cout, K*Cin] in bf16 (lane-dense matmul layout).
    # TODO(synk): deterministic-random init, not ME/PyTorch kaiming init (numerics only).
    for li in range(3):
        cin, cout = channels[li], channels[li + 1]
        w = nrm((Koff, cin, cout), 1.0 / np.sqrt(cin * Koff))
        scale, shift = bn_params(cout)
        w = w * scale[None, None, :]
        p[f"conv{li+1}_w"] = jnp.transpose(w, (2, 0, 1)).reshape(
            cout, Koff * cin).astype(jnp.bfloat16)
        p[f"conv{li+1}_shift"] = shift[:, None].astype(jnp.float32)

    C = channels[-1]
    # Head (SparseLinearBlocks + final Linear), channels-major weights [out, in], f32.
    w1 = nrm((2 * C, C), 1.0 / np.sqrt(C))
    s1, b1 = bn_params(2 * C)
    p["head_w1"] = (w1 * s1[:, None]).astype(jnp.float32)
    p["head_b1"] = b1[:, None].astype(jnp.float32)

    w2 = nrm((C, 2 * C), 1.0 / np.sqrt(2 * C))
    s2, b2 = bn_params(C)
    p["head_w2"] = (w2 * s2[:, None]).astype(jnp.float32)
    p["head_b2"] = b2[:, None].astype(jnp.float32)

    p["head_w3"] = nrm((C, C), 1.0 / np.sqrt(C)).astype(jnp.float32)
    p["head_bias3"] = (0.1 * nrm((C,), 1.0))[:, None].astype(jnp.float32)
    return p


# ----------------------------------------------------------------------------
# Full SparseEncoder forward (eval mode)
# ----------------------------------------------------------------------------
def sparse_encoder_forward(coords, feats, params, num_batches, *, tm=512):
    offsets = build_offsets()
    ts = 1
    feats_cm = jnp.asarray(feats).T.astype(jnp.bfloat16)     # [Cin, N] channels-major

    # conv1 (stride 1) and conv2 (stride 2): one lane-dense matmul kernel each
    c, g, ts = gather_neighbors_cm(coords, feats_cm, 1, ts, offsets)
    f = sparse_conv_bn_lrelu(g, params["conv1_w"], params["conv1_shift"], tm=tm)
    c, g, ts = gather_neighbors_cm(c, f, 2, ts, offsets)
    f = sparse_conv_bn_lrelu(g, params["conv2_w"], params["conv2_shift"], tm=tm)

    # conv3 (stride 2): gathered features stream straight into the fused
    # conv3 + avg-pool + head kernel (M-tiled, VMEM-bounded).
    c, g, ts = gather_neighbors_cm(c, f, 2, ts, offsets)
    M3 = g.shape[1]

    # Per-batch pooling bookkeeping (host glue): batch id per conv3 site + 1/count.
    Bp = _round_up(max(num_batches, 1), 8)
    bids = c[:, 0].astype(np.int32)
    counts = np.bincount(bids, minlength=Bp).astype(np.float32)[:Bp]
    inv_counts = np.where(counts > 0, 1.0 / np.maximum(counts, 1.0), 0.0)[None, :]
    bid_row = bids[None, :]                                   # [1, M3]

    out_cm = conv3_pool_head(g, jnp.asarray(bid_row),
                             jnp.asarray(inv_counts, dtype=np.float32),
                             params, Bp, tm=tm)               # [C, Bp]
    return out_cm.T[:num_batches]                             # [B, C]


if __name__ == "__main__":
    # cfg-implied sizes: DATA_DIM=4, ENCODER.CHANNELS=[1,2,4,8] -> channels [4,8,16,32]
    input_dim = 4
    channels = [m * input_dim for m in (1, 2, 4, 8)]
    B = 2
    grid_size = 16
    pts_per_batch = 32

    k_coords, k_feat, k_par = jax.random.split(jax.random.PRNGKey(0), 3)

    # unique voxel coordinates per batch (coords layout: [batch, x, y, z])
    cells = []
    for b in range(B):
        kb = jax.random.fold_in(k_coords, b)
        flat = np.array(jax.random.permutation(kb, grid_size ** 3)[:pts_per_batch])
        x = flat // (grid_size * grid_size)
        y = (flat // grid_size) % grid_size
        z = flat % grid_size
        cells.append(np.stack([np.full_like(x, b), x, y, z], axis=1))
    coords = np.concatenate(cells, axis=0).astype(np.int64)   # [64, 4]
    N = coords.shape[0]

    feats = jax.random.normal(k_feat, (N, channels[0]), dtype=jnp.float32)  # [64, 4]
    params = init_all_params(k_par, channels)

    out = sparse_encoder_forward(coords, feats, params, B)    # [B, channels[-1]]
    out = jax.block_until_ready(out)
    assert out.shape == (B, channels[-1]) and bool(jnp.all(jnp.isfinite(out)))
    print("KERNEL_OK")
</pallas_src>

<mosaic_0001>
module attributes {stable_mosaic.version = 11 : i64} {
  func.func @_conv_bn_lrelu_kernel(%arg0: i32, %arg1: memref<108x64xbf16, #tpu.memory_space<vmem>>, %arg2: memref<8x108xbf16, #tpu.memory_space<vmem>>, %arg3: memref<8x1xf32, #tpu.memory_space<vmem>>, %arg4: memref<8x64xbf16, #tpu.memory_space<vmem>>) attributes {dimension_semantics = [#tpu.dimension_semantics<parallel>], iteration_bounds = array<i64: 1>, scalar_prefetch = 0 : i64, scratch_operands = 0 : i64, tpu.core_type = #tpu.core_type<tc>, window_params = [{transform_indices = @transform_0, window_bounds = array<i64: 108, 64>}, {pipeline_mode = #tpu.pipeline_mode<synchronous>, transform_indices = @transform_1, window_bounds = array<i64: 8, 108>}, {pipeline_mode = #tpu.pipeline_mode<synchronous>, transform_indices = @transform_2, window_bounds = array<i64: 8, 1>}, {transform_indices = @transform_3, window_bounds = array<i64: 8, 64>}]} {
    %c0 = arith.constant 0 : index
    %c0_0 = arith.constant 0 : index
    %0 = vector.load %arg2[%c0, %c0_0] : memref<8x108xbf16, #tpu.memory_space<vmem>>, vector<8x108xbf16>
    %c0_1 = arith.constant 0 : index
    %c0_2 = arith.constant 0 : index
    %1 = vector.load %arg1[%c0_1, %c0_2] : memref<108x64xbf16, #tpu.memory_space<vmem>>, vector<108x64xbf16>
    %cst = arith.constant dense<0.000000e+00> : vector<8x64xf32>
    %2 = tpu.matmul %0, %1, %cst {dimension_numbers = #tpu.dot_dimension_numbers<[1], [0], [0], [1], [0, 0, 1, 1], [], []>} : vector<8x108xbf16>, vector<108x64xbf16>, vector<8x64xf32> -> vector<8x64xf32>
    %c0_3 = arith.constant 0 : index
    %c0_4 = arith.constant 0 : index
    %3 = vector.load %arg3[%c0_3, %c0_4] : memref<8x1xf32, #tpu.memory_space<vmem>>, vector<8x1xf32>
    %4 = vector.broadcast %3 : vector<8x1xf32> to vector<8x64xf32>
    %5 = arith.addf %2, %4 : vector<8x64xf32>
    %cst_5 = arith.constant 0.000000e+00 : f32
    %6 = vector.broadcast %cst_5 : f32 to vector<8x64xf32>
    %7 = arith.cmpf ogt, %5, %6 : vector<8x64xf32>
    %cst_6 = arith.constant 0.00999999977 : f32
    %8 = vector.broadcast %cst_6 : f32 to vector<8x64xf32>
    %9 = arith.mulf %8, %5 : vector<8x64xf32>
    %10 = arith.select %7, %5, %9 : vector<8x64xi1>, vector<8x64xf32>
    %11 = arith.truncf %10 : vector<8x64xf32> to vector<8x64xbf16>
    %c0_7 = arith.constant 0 : index
    %c0_8 = arith.constant 0 : index
    %12 = vector.load %arg4[%c0_7, %c0_8] : memref<8x64xbf16, #tpu.memory_space<vmem>>, vector<8x64xbf16>
    tpu.vector_store %arg4[%c0_7, %c0_8], %11 {strides = array<i32>} : memref<8x64xbf16, #tpu.memory_space<vmem>>, vector<8x64xbf16>,
    return
  }
  func.func @transform_0(%arg0: i32) -> (i32, i32) {
    %c0_i32 = arith.constant 0 : i32
    %c0_i32_0 = arith.constant 0 : i32
    return %c0_i32, %arg0 : i32, i32
  }
  func.func @transform_1(%arg0: i32) -> (i32, i32) {
    %c0_i32 = arith.constant 0 : i32
    %c0_i32_0 = arith.constant 0 : i32
    %c0_i32_1 = arith.constant 0 : i32
    return %c0_i32, %c0_i32_0 : i32, i32
  }
  func.func @transform_2(%arg0: i32) -> (i32, i32) {
    %c0_i32 = arith.constant 0 : i32
    %c0_i32_0 = arith.constant 0 : i32
    %c0_i32_1 = arith.constant 0 : i32
    return %c0_i32, %c0_i32_0 : i32, i32
  }
  func.func @transform_3(%arg0: i32) -> (i32, i32) {
    %c0_i32 = arith.constant 0 : i32
    %c0_i32_0 = arith.constant 0 : i32
    return %c0_i32, %arg0 : i32, i32
  }
}

</mosaic_0001>

<bundles_post_ra>
// kernel: tpu_custom_call.1
= control target key start
LH: loop header
LB: loop body
LE: loop exit
PB: predicated region body
PF: predicated region fallthrough
CT: control target
= control target key end

     0   :  { %v216_v1 = vmov 0.0   ;;  %vm217_vm0 = vmmov 0   ;;  %v218_v3 = vmov 0   ;;  %s279_s0 = inlined_call_operand.vmem [shape: bf16[108,64], index: 0, kind: input, shape index: {}]   ;;  %s280_s1 = inlined_call_operand.vmem [shape: bf16[8,108], index: 1, kind: input, shape index: {}]   ;;  %s281_s2 = inlined_call_operand.vmem [shape: f32[8,1], index: 2, kind: input, shape index: {}]   ;;  %s282_s3 = inlined_call_operand.hbm [shape: bf16[8,64], index: 3, kind: output, shape index: {}]  }
   0x1   :  { %v185_v0 = vld [vmem:[%s279_s0] sm:$0xff]   ;;  %162 = vmatprep.subr.bf16.mxu0 %v216_v1  ;;  %v186_v2 = vld [vmem:[%s279_s0 + $0x8] sm:$0xff]   ;;  %176 = vmatprep.mubr.msk.bf16.mxu0 %vm217_vm0, %v216_v1  ;;  %v187_v4 = vld [vmem:[%s279_s0 + $0x10] sm:$0xff]  }
   0x2   :  { %163 = vmatpush3.bf16.msra.mxu0 %v185_v0  ;;  %184 = vset.pattern.permute.xlu0 %v218_v3  ;;  %v31_v5 = vld [vmem:[%s281_s2] sm:$0xff] }
   0x3   :  { %164 = vmatprep.subr.bf16.mxu0 %v216_v1 }
   0x6   :  { %165 = vmatpush3.bf16.msra.mxu0 %v186_v2 }
   0x7   :  { %166 = vmatprep.subr.bf16.mxu0 %v216_v1 }
   0x8   :  { %8 = vsyncpa [#allocation3], 0  ;;  %34 = vperm.xlu0 %184, %v31_v5   ;;  %v188_v6 = vld [vmem:[%s279_s0 + $0x18] sm:$0xff]   ;;  %v189_v7 = vld [vmem:[%s279_s0 + $0x20] sm:$0xff]   ;;  %vm82_vm1 = vcmask 1045504   ;;  %vm78_vm2 = vcmask 883712  }
   0x9   :  { %v190_v8 = vld [vmem:[%s279_s0 + $0x28] sm:$0xff]   ;;  %v191_v9 = vld [vmem:[%s279_s0 + $0x30] sm:$0x3f]   ;;  %v16_v11 = vld [vmem:[%s280_s1] sm:$0xf]  ;;  %s219_s0 = smov [#allocation2]  }
   0xa   :  { %167 = vmatpush3.bf16.msra.mxu0 %v187_v4  ;;  %v84_v10 = vsel %vm82_vm1, %v191_v9, 0  ;;  %s138_s29 = sshll.u32 %s219_s0, 4  ;;  %vm130_vm4 = vcmask 519168   ;;  %s139_s29 = int_to_ptr.vmem [resolvable:$true] %s138_s29 }
   0xb   :  { %168 = vmatprep.subr.bf16.mxu0 %v216_v1  ;;  %s192_s30 = scalar_lea.vmem %s139_s29, 64  ;;  %p197_p1 = scmp.lt.s32.totalorder %s139_s29, %s139_s29 }
   0xc   :  { %p193_p0 = scmp.ne.s32.totalorder %s139_s29, %s192_s30  ;;  %p198_p2 = scmp.lt.s32.totalorder %s192_s30, %s192_s30 }
   0xe   :  { %169 = vmatpush3.bf16.msra.mxu0 %v188_v6  ;;  %p199_p3 = por %p198_p2, %p197_p1 }
   0xf   :  { %170 = vmatprep.subr.bf16.mxu0 %v216_v1 }
  0x10   :  { %p200_p4 = pnand %p199_p3, %p193_p0 }
  0x12   :  { %171 = vmatpush3.bf16.msra.mxu0 %v189_v7 }
  0x13   :  { %172 = vmatprep.subr.bf16.mxu0 %v216_v1 }
  0x16   :  { %173 = vmatpush3.bf16.msra.mxu0 %v190_v8 }
  0x17   :  { %174 = vmatprep.subr.bf16.mxu0 %v216_v1 }
  0x1a   :  { %175 = vmatpush3.bf16.msra.mxu0 %v84_v10 }
  0x1d   :  { %177 = vmatmul.mubr.msk.bf16.vlgmr.msra.gmra.mrb[0].mxu0 %vm78_vm2, %v16_v11 }
  0x87   :  { %v35_v12 = vpop.permute.xlu0 %34 }
  0xf0   :  { %v120_v13 = vpop.f32.mrb[0].mxu0 }
  0xf1   :  { %v121_v14 = vadd.f32 %v120_v13, %v35_v12  ;;  %v178_v15 = vpop.f32.mrb[1].mxu0 }
  0xf2   :  { %v123_v16 = vpop.f32.mrb[2].mxu0 }
  0xf3   :  { %vm126_vm3 = vcmp.gt.f32.partialorder %v121_v14, 0.0  ;;  %v127_v17 = vmul.f32 0.01, %v121_v14  ;;  %v179_v18 = vpop.f32.mrb[3].mxu0 }
  0xf5   :  { %v128_v19 = vsel %vm126_vm3, %v121_v14, %v127_v17 }
  0xf6   :  { %v129_v20 = vpack.c.bf16 %v128_v19, %v128_v19 }
  0xf8   :  { %131 = vst.msk [vmem:[#allocation2] sm:$0xf] %vm130_vm4, %v129_v20 }
  0xf9   :  { %203 = shalt.err (!%p200_p4)
}
  0xfa   :  { %s204_s5 = scalar_lea.hbm %s282_s3, 64 }
  0xfb   :  { %p205_p5 = scmp.ne.s32.totalorder %s282_s3, %s204_s5  ;;  %p208_p6 = scmp.lt.u32.totalorder %s204_s5, %s282_s3 }
  0xfd   :  { %p210_p7 = pnand %p208_p6, %p205_p5 }
  0xff   :  { %213 = shalt.err (!%p210_p7)
}
 0x100   :  { %141 = dma.vmem_to_hbm [thread:$0]  %s139_s29, 64, %s282_s3, [#allocation3]  }
 0x101   :  { %214 = dma.done.wait [#allocation3], 64  }
 0x102   :  { %215 = vsyncadd [#allocation3], 4294967232 }
 0x103   :  { %145 = vsyncpa [#allocation3], 1 }

</bundles_post_ra>
